<compile_context>
chip_gen: v5e
topology: v5e:2x2
jax: 0.10.0
libtpu: 0.0.40
codegen_flags: <defaults>
</compile_context>

<pallas_src>
import functools

import jax
import jax.numpy as jnp
from jax import lax
from jax.experimental import pallas as pl
from jax.experimental.pallas import tpu as pltpu

_EPS = 1e-5
_LANES = 128

_COMPILER_PARAMS = pltpu.CompilerParams(
    dimension_semantics=("parallel",),
    vmem_limit_bytes=32 * 1024 * 1024,
)


def _round_up(x, m):
    return (x + m - 1) // m * m


def _pick_tile_m(m_rows):
    """Rows of the patch matrix processed per grid step."""
    if m_rows >= 1024:
        return 512
    # small problems: keep >= 2 grid steps so the pipeline / multi-tile stats
    # path is actually exercised
    half = _round_up(m_rows, 8) // 2
    return max(8, half - half % 8)


# ----------------------------- Pallas kernels ------------------------------ #
def _matmul_stats_kernel(p_ref, w_ref, y_ref, stats_ref):
    """Pre-BN conv tile (bf16 x bf16 -> f32 on MXU) + per-tile channel stats."""
    y = jnp.dot(p_ref[...], w_ref[...], preferred_element_type=jnp.float32)
    y_ref[...] = y
    s = jnp.sum(y, axis=0, keepdims=True)          # (1, Ctot)
    ss = jnp.sum(y * y, axis=0, keepdims=True)     # (1, Ctot)
    stats_ref[...] = jnp.concatenate([s, ss], axis=0)[None, :, :]


def _bn_act_kernel(y_ref, scale_ref, shift_ref, o_ref, *, relu):
    """out = [relu]( y * scale + shift )  (scale/shift fold gamma,beta,mean,var)."""
    out = y_ref[...] * scale_ref[...] + shift_ref[...]
    if relu:
        out = jnp.maximum(out, 0.0)
    o_ref[...] = out


def _bn_add_relu_kernel(y_ref, r_ref, sy_ref, by_ref, sr_ref, br_ref, o_ref):
    """out = relu( bn(y) + bn_or_identity(residual) )."""
    out = y_ref[...] * sy_ref[...] + by_ref[...]
    out = out + (r_ref[...] * sr_ref[...] + br_ref[...])
    o_ref[...] = jnp.maximum(out, 0.0)


# --------------------------- pallas_call wrappers --------------------------- #
def _conv_matmul_stats(patches_bf16, weights_bf16, tile_m):
    """patches: (m_pad, k_pad) bf16; weights: (k_pad, ctot) bf16."""
    m_pad, k_pad = patches_bf16.shape
    ctot = weights_bf16.shape[1]
    grid_m = m_pad // tile_m
    y, part = pl.pallas_call(
        _matmul_stats_kernel,
        grid=(grid_m,),
        in_specs=[
            pl.BlockSpec((tile_m, k_pad), lambda i: (i, 0)),
            pl.BlockSpec((k_pad, ctot), lambda i: (0, 0)),      # weights resident
        ],
        out_specs=[
            pl.BlockSpec((tile_m, ctot), lambda i: (i, 0)),
            pl.BlockSpec((1, 2, ctot), lambda i: (i, 0, 0)),     # per-tile stats
        ],
        out_shape=[
            jax.ShapeDtypeStruct((m_pad, ctot), jnp.float32),
            jax.ShapeDtypeStruct((grid_m, 2, ctot), jnp.float32),
        ],
        compiler_params=_COMPILER_PARAMS,
    )(patches_bf16, weights_bf16)
    stats = jnp.sum(part, axis=0)                  # global (2, ctot) reduction
    return y, stats


def _bn_act(y_full, col_block, scale, shift, cpad, tile_m, relu):
    m_pad = y_full.shape[0]
    grid_m = m_pad // tile_m
    vec = pl.BlockSpec((1, cpad), lambda i: (0, 0))
    return pl.pallas_call(
        functools.partial(_bn_act_kernel, relu=relu),
        grid=(grid_m,),
        in_specs=[
            pl.BlockSpec((tile_m, cpad), lambda i: (i, col_block)),
            vec, vec,
        ],
        out_specs=pl.BlockSpec((tile_m, cpad), lambda i: (i, 0)),
        out_shape=jax.ShapeDtypeStruct((m_pad, cpad), jnp.float32),
        compiler_params=_COMPILER_PARAMS,
    )(y_full, scale, shift)


def _bn_add_relu(y2, res_full, res_col, s2, b2, sr, br, cpad, tile_m):
    m_pad = y2.shape[0]
    grid_m = m_pad // tile_m
    vec = pl.BlockSpec((1, cpad), lambda i: (0, 0))
    return pl.pallas_call(
        _bn_add_relu_kernel,
        grid=(grid_m,),
        in_specs=[
            pl.BlockSpec((tile_m, cpad), lambda i: (i, 0)),
            pl.BlockSpec((tile_m, cpad), lambda i: (i, res_col)),
            vec, vec, vec, vec,
        ],
        out_specs=pl.BlockSpec((tile_m, cpad), lambda i: (i, 0)),
        out_shape=jax.ShapeDtypeStruct((m_pad, cpad), jnp.float32),
        compiler_params=_COMPILER_PARAMS,
    )(y2, res_full, s2, b2, sr, br)


# ------------------------------ JAX-side glue ------------------------------- #
def _extract_patches(x_nhwc, ksize, stride, pad):
    """im2col: NHWC -> (N*Ho*Wo, ksize*ksize*C); row order = NHWC output order."""
    n, h, w, c = x_nhwc.shape
    xp = jnp.pad(x_nhwc, ((0, 0), (pad, pad), (pad, pad), (0, 0)))
    ho = (h + 2 * pad - ksize) // stride + 1
    wo = (w + 2 * pad - ksize) // stride + 1
    cols = []
    for di in range(ksize):
        for dj in range(ksize):
            cols.append(xp[:, di:di + stride * ho:stride, dj:dj + stride * wo:stride, :])
    patches = jnp.concatenate(cols, axis=-1)
    return patches.reshape(n * ho * wo, ksize * ksize * c), ho, wo


def _w2mat(w_oihw):
    """PyTorch (O, I, kh, kw) conv weight -> (kh*kw*I, O) matching patch order."""
    o = w_oihw.shape[0]
    return jnp.transpose(w_oihw, (2, 3, 1, 0)).reshape(-1, o)


def _pad2d(a, rows, cols):
    return jnp.pad(a, ((0, rows - a.shape[0]), (0, cols - a.shape[1])))


def _bn_scale_shift(stats, count, gamma, beta, cpad):
    """Fold BN into y*scale + shift. Padded channels get scale = shift = 0."""
    s, ss = stats[0], stats[1]
    mean = s / count
    var = jnp.maximum(ss / count - mean * mean, 0.0)   # biased var (PyTorch train)
    inv = lax.rsqrt(var + _EPS)
    g = jnp.zeros((cpad,), jnp.float32).at[: gamma.shape[0]].set(gamma)
    b = jnp.zeros((cpad,), jnp.float32).at[: beta.shape[0]].set(beta)
    scale = g * inv
    shift = b - mean * scale
    return scale[None, :], shift[None, :]


def init_basic_block_params(key, in_planes, planes, stride):
    k1, k2, k3 = jax.random.split(key, 3)
    params = {
        "w1": 0.1 * jax.random.normal(k1, (planes, in_planes, 3, 3), jnp.float32),
        "g1": jnp.ones((planes,), jnp.float32),
        "b1": jnp.zeros((planes,), jnp.float32),
        "w2": 0.1 * jax.random.normal(k2, (planes, planes, 3, 3), jnp.float32),
        "g2": jnp.ones((planes,), jnp.float32),
        "b2": jnp.zeros((planes,), jnp.float32),
    }
    if stride != 1 or in_planes != planes:  # expansion == 1
        params["ws"] = 0.1 * jax.random.normal(k3, (planes, in_planes, 1, 1), jnp.float32)
        params["gs"] = jnp.ones((planes,), jnp.float32)
        params["bs"] = jnp.zeros((planes,), jnp.float32)
    return params


def basic_block_forward(params, x_nchw, stride):
    """Forward pass of BasicBlock; input/output are NCHW like PyTorch."""
    x = jnp.transpose(x_nchw, (0, 2, 3, 1)).astype(jnp.float32)       # -> NHWC
    n, h, w, cin = x.shape
    planes = params["w1"].shape[0]
    has_sc = "ws" in params

    cpad = _round_up(planes, _LANES)           # lane-dense output channels
    ctot = 2 * cpad if has_sc else cpad        # conv1 and shortcut fused

    # ------------- conv1 (3x3, stride) [+ fused 1x1 shortcut conv] ----------
    p1, ho, wo = _extract_patches(x, 3, stride, 1)
    m = n * ho * wo
    tile_m = _pick_tile_m(m)
    m_pad = _round_up(m, tile_m)
    k1 = p1.shape[1]
    k1_pad = _round_up(k1, _LANES)

    wbig = jnp.zeros((k1_pad, ctot), jnp.float32)
    wbig = wbig.at[:k1, :planes].set(_w2mat(params["w1"]))
    if has_sc:
        # centre tap (di=dj=1) of the 3x3/pad=1 patch == the 1x1/stride conv input
        wbig = wbig.at[4 * cin:5 * cin, cpad:cpad + planes].set(_w2mat(params["ws"]))

    p1p = _pad2d(p1, m_pad, k1_pad).astype(jnp.bfloat16)
    y1c, stats1 = _conv_matmul_stats(p1p, wbig.astype(jnp.bfloat16), tile_m)

    scale1, shift1 = _bn_scale_shift(stats1[:, :cpad], m,
                                     params["g1"], params["b1"], cpad)
    a1 = _bn_act(y1c, 0, scale1, shift1, cpad, tile_m, relu=True)

    # ---------------------- conv2 (3x3, stride 1) ---------------------------
    a1_nhwc = a1[:m, :planes].reshape(n, ho, wo, planes)
    p2, _, _ = _extract_patches(a1_nhwc, 3, 1, 1)
    k2 = p2.shape[1]
    k2_pad = _round_up(k2, _LANES)
    w2 = jnp.zeros((k2_pad, cpad), jnp.float32).at[:k2, :planes].set(
        _w2mat(params["w2"]))
    p2p = _pad2d(p2, m_pad, k2_pad).astype(jnp.bfloat16)
    y2, stats2 = _conv_matmul_stats(p2p, w2.astype(jnp.bfloat16), tile_m)
    scale2, shift2 = _bn_scale_shift(stats2, m, params["g2"], params["b2"], cpad)

    # --------------- bn2 + residual (bn_sc or identity) + relu --------------
    if has_sc:
        scale_r, shift_r = _bn_scale_shift(stats1[:, cpad:], m,
                                           params["gs"], params["bs"], cpad)
        res_full, res_col = y1c, 1            # shortcut pre-BN output lives here
    else:
        scale_r = jnp.ones((1, cpad), jnp.float32)
        shift_r = jnp.zeros((1, cpad), jnp.float32)
        res_full = _pad2d(x.reshape(n * h * w, cin), m_pad, cpad)
        res_col = 0

    out = _bn_add_relu(y2, res_full, res_col, scale2, shift2,
                       scale_r, shift_r, cpad, tile_m)
    out = out[:m, :planes].reshape(n, ho, wo, planes)
    return jnp.transpose(out, (0, 3, 1, 2))   # back to NCHW


# ------------------------- pure-JAX reference (check) ----------------------- #
def _ref_forward(params, x, stride):
    def rb(t):  # bf16 round-trip: matches the MXU operand precision in the kernel
        return t.astype(jnp.bfloat16).astype(jnp.float32)

    def conv(inp, wgt, s, pad):
        return lax.conv_general_dilated(
            rb(inp), rb(wgt), (s, s), ((pad, pad), (pad, pad)),
            dimension_numbers=("NCHW", "OIHW", "NCHW"),
            precision=lax.Precision.HIGHEST)

    def bn(y, g, b):
        mean = jnp.mean(y, axis=(0, 2, 3), keepdims=True)
        var = jnp.mean(jnp.square(y - mean), axis=(0, 2, 3), keepdims=True)
        return ((y - mean) * lax.rsqrt(var + _EPS)
                * g[None, :, None, None] + b[None, :, None, None])

    a1 = jax.nn.relu(bn(conv(x, params["w1"], stride, 1), params["g1"], params["b1"]))
    out = bn(conv(a1, params["w2"], 1, 1), params["g2"], params["b2"])
    if "ws" in params:
        sc = bn(conv(x, params["ws"], stride, 0), params["gs"], params["bs"])
    else:
        sc = x
    return jax.nn.relu(out + sc)


if __name__ == "__main__":
    key = jax.random.PRNGKey(0)

    configs = [
        # (in_planes, planes, stride, H=W)
        (4, 8, 2, 16),   # exercises the fused 1x1 conv shortcut
        (8, 8, 1, 16),   # exercises the identity shortcut
    ]
    for idx, (in_planes, planes, stride, hw) in enumerate(configs):
        kx, kp = jax.random.split(jax.random.fold_in(key, idx))
        x = jax.random.normal(kx, (2, in_planes, hw, hw), jnp.float32)  # NCHW
        params = init_basic_block_params(kp, in_planes, planes, stride)

        out = jax.block_until_ready(basic_block_forward(params, x, stride))
        ref = _ref_forward(params, x, stride)
        assert out.shape == ref.shape == (2, planes, hw // stride, hw // stride)
        max_err = float(jnp.max(jnp.abs(out - ref)))
        assert max_err < 5e-3, f"config {idx}: mismatch vs reference, max abs err = {max_err}"

    print("KERNEL_OK")
</pallas_src>

<mosaic_0001>
module attributes {stable_mosaic.version = 11 : i64} {
  func.func @_matmul_stats_kernel(%arg0: i32, %arg1: memref<64x128xbf16, #tpu.memory_space<vmem>>, %arg2: memref<128x256xbf16, #tpu.memory_space<vmem>>, %arg3: memref<64x256xf32, #tpu.memory_space<vmem>>, %arg4: memref<1x2x256xf32, #tpu.memory_space<vmem>>) attributes {dimension_semantics = [#tpu.dimension_semantics<parallel>], iteration_bounds = array<i64: 2>, scalar_prefetch = 0 : i64, scratch_operands = 0 : i64, tpu.core_type = #tpu.core_type<tc>, window_params = [{transform_indices = @transform_0, window_bounds = array<i64: 64, 128>}, {pipeline_mode = #tpu.pipeline_mode<synchronous>, transform_indices = @transform_1, window_bounds = array<i64: 128, 256>}, {transform_indices = @transform_2, window_bounds = array<i64: 64, 256>}, {transform_indices = @transform_3, window_bounds = array<i64: 1, 2, 256>}]} {
    %c0 = arith.constant 0 : index
    %c0_0 = arith.constant 0 : index
    %0 = vector.load %arg1[%c0, %c0_0] : memref<64x128xbf16, #tpu.memory_space<vmem>>, vector<64x128xbf16>
    %c0_1 = arith.constant 0 : index
    %c0_2 = arith.constant 0 : index
    %1 = vector.load %arg2[%c0_1, %c0_2] : memref<128x256xbf16, #tpu.memory_space<vmem>>, vector<128x256xbf16>
    %cst = arith.constant dense<0.000000e+00> : vector<64x256xf32>
    %2 = tpu.matmul %0, %1, %cst {dimension_numbers = #tpu.dot_dimension_numbers<[1], [0], [0], [1], [0, 0, 1, 1], [], []>} : vector<64x128xbf16>, vector<128x256xbf16>, vector<64x256xf32> -> vector<64x256xf32>
    %c0_3 = arith.constant 0 : index
    %c0_4 = arith.constant 0 : index
    %3 = vector.load %arg3[%c0_3, %c0_4] : memref<64x256xf32, #tpu.memory_space<vmem>>, vector<64x256xf32>
    tpu.vector_store %arg3[%c0_3, %c0_4], %2 {strides = array<i32>} : memref<64x256xf32, #tpu.memory_space<vmem>>, vector<64x256xf32>,
    %cst_5 = arith.constant dense<0.000000e+00> : vector<256xf32>
    %4 = vector.multi_reduction <add>, %2, %cst_5 [0] : vector<64x256xf32> to vector<256xf32>
    %5 = vector.shape_cast %4 : vector<256xf32> to vector<1x256xf32>
    %6 = arith.mulf %2, %2 : vector<64x256xf32>
    %cst_6 = arith.constant dense<0.000000e+00> : vector<256xf32>
    %7 = vector.multi_reduction <add>, %6, %cst_6 [0] : vector<64x256xf32> to vector<256xf32>
    %8 = vector.shape_cast %7 : vector<256xf32> to vector<1x256xf32>
    %9 = tpu.concatenate %5, %8 in 0 : vector<1x256xf32>, vector<1x256xf32> -> vector<2x256xf32>
    %10 = vector.shape_cast %9 : vector<2x256xf32> to vector<1x2x256xf32>
    %c0_7 = arith.constant 0 : index
    %c0_8 = arith.constant 0 : index
    %c0_9 = arith.constant 0 : index
    %11 = vector.load %arg4[%c0_7, %c0_8, %c0_9] : memref<1x2x256xf32, #tpu.memory_space<vmem>>, vector<1x2x256xf32>
    tpu.vector_store %arg4[%c0_7, %c0_8, %c0_9], %10 {strides = array<i32>} : memref<1x2x256xf32, #tpu.memory_space<vmem>>, vector<1x2x256xf32>,
    return
  }
  func.func @transform_0(%arg0: i32) -> (i32, i32) {
    %c0_i32 = arith.constant 0 : i32
    %c0_i32_0 = arith.constant 0 : i32
    return %arg0, %c0_i32 : i32, i32
  }
  func.func @transform_1(%arg0: i32) -> (i32, i32) {
    %c0_i32 = arith.constant 0 : i32
    %c0_i32_0 = arith.constant 0 : i32
    %c0_i32_1 = arith.constant 0 : i32
    return %c0_i32, %c0_i32_0 : i32, i32
  }
  func.func @transform_2(%arg0: i32) -> (i32, i32) {
    %c0_i32 = arith.constant 0 : i32
    %c0_i32_0 = arith.constant 0 : i32
    return %arg0, %c0_i32 : i32, i32
  }
  func.func @transform_3(%arg0: i32) -> (i32, i32, i32) {
    %c0_i32 = arith.constant 0 : i32
    %c0_i32_0 = arith.constant 0 : i32
    %c0_i32_1 = arith.constant 0 : i32
    return %arg0, %c0_i32, %c0_i32_0 : i32, i32, i32
  }
}

</mosaic_0001>

<bundles_post_ra>
// kernel: tpu_custom_call.1
= control target key start
LH: loop header
LB: loop body
LE: loop exit
PB: predicated region body
PF: predicated region fallthrough
CT: control target
= control target key end

     0   :  { %9 = vsyncpa [#allocation3], 0  ;;  %s1243_s0 = inlined_call_operand.hbm [shape: bf16[128,128], index: 0, kind: input, shape index: {}]   ;;  %s1244_s1 = inlined_call_operand.hbm [shape: bf16[128,256], index: 1, kind: input, shape index: {}]   ;;  %s1245_s2 = inlined_call_operand.hbm [shape: f32[128,256], index: 2, kind: output, shape index: {0}]   ;;  %s1246_s3 = inlined_call_operand.hbm [shape: f32[2,2,256], index: 3, kind: output, shape index: {1}]  }
   0x1   :  { %11 = vsyncpa [#allocation3 + $0x1], 0 }
   0x2   :  { %12 = vsyncpa [#allocation6], 0 }
   0x3   :  { %13 = vsyncpa [#allocation4], 0 }
   0x4   :  { %15 = vsyncpa [#allocation4 + $0x1], 0 }
   0x5   :  { %16 = vsyncpa [#allocation9], 0 }
   0x6   :  { %18 = vsyncpa [#allocation9 + $0x1], 0  ;;  %s1054_s12 = smov 0   ;;  %s1056_s13 = smov 0  }
   0x7   :  { %s1058_s14 = smov 0   ;;  %s1060_s15 = smov 0  }
   0x8 LB: > { %s1075_s16 = sadd.s32 4294967295, %s1025_s15   ;;  %s654_s17 = sadd.s32 4294967294, %s1025_s15   ;;  %s1025_s15 = sphi %s1060_s15, %s1256_s15   ;;  %s1021_s14 = sphi %s1058_s14, %s1255_s14   ;;  %s1017_s13 = sphi %s1056_s13, %s1254_s13   ;;  %s1013_s12 = sphi %s1054_s12, %s1253_s12  }
   0x9   : > { %p44_p0 = scmp.ne.s32.totalorder %s1017_s13, %s1013_s12  ;;  %p45_p1 = scmp.eq.s32.totalorder %s1075_s16, 0 }
   0xa   : > { %p89_p2 = scmp.eq.s32.totalorder %s1075_s16, 1  ;;  %p95_p3 = scmp.eq.s32.totalorder %s654_s17, 1 }
   0xb   : > { %p1084_p4 = por %p45_p1, %p44_p0  ;;  %p655_p5 = scmp.ge.s32.totalorder %s1025_s15, 1 }
   0xc   : > { %p1089_p6 = por %p95_p3, %p44_p0  ;;  %p128_p7 = scmp.lt.s32.totalorder %s1025_s15, 3 }
   0xd   : > { %s139_s22 = sshll.u32 %s1244_s1, 4  ;;  %s1027_s24 = smov [#allocation5]   ;;  %s140_s22 = int_to_ptr.hbm [resolvable:$true] %s139_s22 }
   0xe   : > { %p1097_p8 = pnand %p655_p5, %p128_p7  ;;  %s141_s25 = sshll.u32 %s1027_s24, 4  ;;  %s142_s25 = int_to_ptr.vmem [resolvable:$true] %s141_s25 }
   0xf   : > { %s1107_s26 = sadd.s32 1, %s1025_s15   ;;  %s1028_s27 = smov 128  }
  0x10   : > { %p805_p9 = pneg %p1097_p8  ;;  %s1029_s28 = smov 8  }
  0x11   : > { %s28_s29 = ssub.s32 %s1025_s15, %s1107_s26  ;;  %s31_s30 = sadd.s32 1, %s1021_s14 }
  0x12   : > { %p806_p10 = pnand %p805_p9, %p45_p1  ;;  %p29_p12 = scmp.eq.s32.totalorder %s28_s29, 0 }
  0x13   : > { %p38_p13 = scmp.ne.s32.totalorder %s1021_s14, %s1017_s13  ;;  %p39_p0 = scmp.eq.s32.totalorder %s1025_s15, 0 }
  0x14   : > { %808 = dma.hbm_to_vmem [thread:$0]  (!%p806_p10), %s140_s22, 2048, %s142_s25, [#allocation6], %s1028_s27, %s1028_s27, %s1029_s28  }
  0x15   : > { %p821_p3 = scmp.lt.s32.totalorder %s1025_s15, 2  ;;  %p40_p5 = por %p39_p0, %p38_p13 }
  0x16   : > { %s1117_s4 = scalar_select %p29_p12, %s1021_s14, %s31_s30  }
  0x17   : > { %p1121_p7 = por %p89_p2, %p38_p13  ;;  %s155_s6 = sand.u32 1, %s1021_s14  }
  0x18   : > { %s755_s7 = sshll.u32 %s1025_s15, 5  ;;  %s658_s8 = sshll.u32 %s155_s6, 5 }
  0x19   : > { %s164_s11 = scalar_lea.hbm %s1243_s0, %s755_s7  ;;  %s159_s20 = scalar_lea.vmem [#allocation2], %s658_s8 }
  0x1a   : > { %s165_s17 = sshll.u32 %s164_s11, 4  ;;  %s167_s21 = sshll.u32 %s159_s20, 4  ;;  %s166_s17 = int_to_ptr.hbm [resolvable:$true] %s165_s17  ;;  %s168_s21 = int_to_ptr.vmem [resolvable:$true] %s167_s21 }
  0x1b   : > { %p1132_p9 = pnand %p821_p3, %p40_p5  ;;  %s156_s24 = scalar_lea.sflag [#allocation3], %s155_s6 }
  0x1c   : > { %s893_s25 = sshra.s32 %s166_s17, 4  ;;  %s900_s30 = scalar_lea.hbm %s1243_s0, 64  ;;  %s894_s25 = int_to_ptr.hbm [resolvable:$true] %s893_s25 }
  0x1d   : > { %s895_s27 = scalar_lea.hbm %s894_s25, 32  ;;  %p897_p10 = pneg %p1132_p9 }
  0x1e   : > { %p896_p2 = scmp.ne.s32.totalorder %s894_s25, %s895_s27  ;;  %p901_p0 = scmp.lt.s32.totalorder %s894_s25, %s1243_s0 }
  0x1f   : > { %p902_p3 = scmp.lt.s32.totalorder %s900_s30, %s895_s27 }
  0x20   : > { %p898_p12 = pnand %p897_p10, %p896_p2 }
  0x21   : > { %p903_p5 = por %p902_p3, %p901_p0 }
  0x22   : > { %p899_p13 = pneg %p898_p12 }
  0x24   : > { %p904_p11 = pnand %p903_p5, %p899_p13 }
  0x26   : > { %907 = shalt.err (!%p904_p11)
}
  0x27   : > { %s1030_s6 = smov 64   ;;  %s1031_s9 = smov 4  }
  0x28   : > { %812 = dma.hbm_to_vmem [thread:$0]  (!%p1132_p9), %s166_s17, 512, %s168_s21, %s156_s24, %s1030_s6, %s1030_s6, %s1031_s9  }
  0x29   : > { %179 = sbr.rel (%p1097_p8) target bundleno = 266 (0x10a), region = 28  ;;  %s1149_s10 = sand.u32 (!%p1097_p8), 1, %s1017_s13  }
  0x2a   : > { %s662_s11 = sshll.u32 (!%p1097_p8), %s1149_s10, 5  ;;  %s182_s20 = scalar_lea.sflag (!%p1097_p8), [#allocation3], %s1149_s10 }
  0x2b   : > { %s1153_s25 = scalar_lea.vmem (!%p1097_p8), [#allocation2], %s662_s11 }
  0x2e   : > { %996 = dma.done.wait (%p1084_p4), %s182_s20, 512  }
  0x2f   : > { %998 = vsyncadd (%p1084_p4), %s182_s20, 4294966784 }
  0x30   : > { %1000 = dma.done.wait (%p45_p1), [#allocation6], 2048  }
  0x31   : > { %1002 = vsyncadd (%p45_p1), [#allocation6], 4294965248  ;;  %v740_v0 = vld [vmem:[#allocation5 + $0x70] sm:$0xf]  ;;  %v775_v1 = vld [vmem:[#allocation5 + $0x74] sm:$0xf0] }
  0x32   : > { %v774_v2 = vld [vmem:[#allocation5 + $0x74] sm:$0xf]  ;;  %v741_v3 = vor.u32 %v775_v1, %v740_v0  ;;  %v742_v4 = vld [vmem:[#allocation5 + $0x78] sm:$0xf0]  ;;  %v732_v5 = vld [vmem:[#allocation5 + $0x60] sm:$0xf] }
  0x33   : > { %v773_v6 = vld [vmem:[#allocation5 + $0x64] sm:$0xf0]  ;;  %v745_v7 = vor.u32 %v774_v2, %v742_v4  ;;  %v772_v8 = vld [vmem:[#allocation5 + $0x64] sm:$0xf]  ;;  %v734_v9 = vld [vmem:[#allocation5 + $0x68] sm:$0xf0] }
  0x34   : > { %349 = vmatpush.bf16.msra.mxu0 %v741_v3  ;;  %779 = vmatpush.bf16.msra.mxu2 %v741_v3  ;;  %v733_v10 = vor.u32 %v773_v6, %v732_v5  ;;  %v737_v11 = vor.u32 %v772_v8, %v734_v9  ;;  %v724_v12 = vld [vmem:[#allocation5 + $0x50] sm:$0xf]  ;;  %v771_v13 = vld [vmem:[#allocation5 + $0x54] sm:$0xf0]  ;;  %v770_v14 = vld [vmem:[#allocation5 + $0x54] sm:$0xf] }
  0x35   : > { %378 = vmatpush.bf16.msra.mxu1 %v745_v7  ;;  %787 = vmatpush.bf16.msra.mxu3 %v745_v7  ;;  %v726_v15 = vld [vmem:[#allocation5 + $0x58] sm:$0xf0]  ;;  %v725_v16 = vor.u32 %v771_v13, %v724_v12  ;;  %v716_v18 = vld [vmem:[#allocation5 + $0x40] sm:$0xf]  ;;  %v769_v19 = vld [vmem:[#allocation5 + $0x44] sm:$0xf0] }
  0x36   : > { %v729_v17 = vor.u32 %v770_v14, %v726_v15  ;;  %v768_v20 = vld [vmem:[#allocation5 + $0x44] sm:$0xf]  ;;  %v718_v21 = vld [vmem:[#allocation5 + $0x48] sm:$0xf0]  ;;  %v717_v22 = vor.u32 %v769_v19, %v716_v18  ;;  %v708_v24 = vld [vmem:[#allocation5 + $0x30] sm:$0xf] }
  0x37   : > { %v721_v23 = vor.u32 %v768_v20, %v718_v21  ;;  %v767_v25 = vld [vmem:[#allocation5 + $0x34] sm:$0xf0]  ;;  %v766_v26 = vld [vmem:[#allocation5 + $0x34] sm:$0xf]  ;;  %v710_v27 = vld [vmem:[#allocation5 + $0x38] sm:$0xf0] }
  0x38   : > { %350 = vmatpush.bf16.msra.mxu0 %v733_v10  ;;  %780 = vmatpush.bf16.msra.mxu2 %v733_v10  ;;  %v709_v28 = vor.u32 %v767_v25, %v708_v24  ;;  %v713_v29 = vor.u32 %v766_v26, %v710_v27  ;;  %v700_v30 = vld [vmem:[#allocation5 + $0x20] sm:$0xf]  ;;  %v765_v31 = vld [vmem:[#allocation5 + $0x24] sm:$0xf0]  ;;  %v764_v32 = vld [vmem:[#allocation5 + $0x24] sm:$0xf] }
  0x39   : > { %379 = vmatpush.bf16.msra.mxu1 %v737_v11  ;;  %788 = vmatpush.bf16.msra.mxu3 %v737_v11  ;;  %v702_v33 = vld [vmem:[#allocation5 + $0x28] sm:$0xf0]  ;;  %v701_v34 = vor.u32 %v765_v31, %v700_v30  ;;  %v692_v36 = vld [vmem:[#allocation5 + $0x10] sm:$0xf]  ;;  %v763_v37 = vld [vmem:[#allocation5 + $0x14] sm:$0xf0] }
  0x3a   : > { %v705_v35 = vor.u32 %v764_v32, %v702_v33  ;;  %v762_v38 = vld [vmem:[#allocation5 + $0x14] sm:$0xf]  ;;  %v694_v39 = vld [vmem:[#allocation5 + $0x18] sm:$0xf0]  ;;  %v693_v40 = vor.u32 %v763_v37, %v692_v36  ;;  %v684_v42 = vld [vmem:[#allocation5] sm:$0xf] }
  0x3b   : > { %v697_v41 = vor.u32 %v762_v38, %v694_v39  ;;  %v761_v43 = vld [vmem:[#allocation5 + $0x4] sm:$0xf0]  ;;  %v760_v44 = vld [vmem:[#allocation5 + $0x4] sm:$0xf]  ;;  %v686_v45 = vld [vmem:[#allocation5 + $0x8] sm:$0xf0] }
  0x3c   : > { %351 = vmatpush.bf16.msra.mxu0 %v725_v16  ;;  %781 = vmatpush.bf16.msra.mxu2 %v725_v16  ;;  %v685_v46 = vor.u32 %v761_v43, %v684_v42  ;;  %v689_v47 = vor.u32 %v760_v44, %v686_v45  ;;  %v756_v48 = vld [vmem:[%s1153_s25] sm:$0xff]  ;;  %v758_v49 = vld [vmem:[%s1153_s25 + $0x10] sm:$0xff]  ;;  %v757_v50 = vld [vmem:[%s1153_s25 + $0x8] sm:$0xff]  ;;  %s664_s18 = sshll.u32 %s1149_s10, 7  ;;  %s777_s17 = sshll.u32 %s1075_s16, 7 }
  0x3d   : > { %380 = vmatpush.bf16.msra.mxu1 %v729_v17  ;;  %789 = vmatpush.bf16.msra.mxu3 %v729_v17  ;;  %v759_v51 = vld [vmem:[%s1153_s25 + $0x18] sm:$0xff]  ;;  %s1168_s23 = scalar_lea.vmem [#allocation7], %s664_s18  ;;  %s519_s24 = scalar_lea.hbm %s1245_s2, %s777_s17 }
  0x3e   : > { %s520_s27 = sshll.u32 %s1168_s23, 4  ;;  %s522_s28 = sshll.u32 %s519_s24, 4  ;;  %s1189_s27 = int_to_ptr.vmem [resolvable:$true] %s520_s27  ;;  %s1191_s28 = int_to_ptr.hbm [resolvable:$true] %s522_s28 }
  0x3f   : > { %s502_s29 = scalar_lea.sflag [#allocation4], %s1149_s10  ;;  %s937_s30 = sshra.s32 %s1191_s28, 4  ;;  %s938_s30 = int_to_ptr.hbm [resolvable:$true] %s937_s30 }
  0x40   : > { %352 = vmatpush.bf16.msra.mxu0 %v717_v22  ;;  %782 = vmatpush.bf16.msra.mxu2 %v717_v22  ;;  %s939_s7 = scalar_lea.hbm %s938_s30, 128  ;;  %s943_s9 = scalar_lea.hbm %s1245_s2, 256 }
  0x41   : > { %381 = vmatpush.bf16.msra.mxu1 %v721_v23  ;;  %790 = vmatpush.bf16.msra.mxu3 %v721_v23  ;;  %p940_p1 = scmp.ne.s32.totalorder %s938_s30, %s939_s7  ;;  %p944_p11 = scmp.lt.s32.totalorder %s938_s30, %s1245_s2 }
  0x42   : > { %p945_p9 = scmp.lt.s32.totalorder %s943_s9, %s939_s7 }
  0x43   : > { %p941_p4 = pnand %p940_p1, %p1121_p7 }
  0x44   : > { %353 = vmatpush.bf16.msra.mxu0 %v709_v28  ;;  %783 = vmatpush.bf16.msra.mxu2 %v709_v28  ;;  %p946_p2 = por %p945_p9, %p944_p11 }
  0x45   : > { %382 = vmatpush.bf16.msra.mxu1 %v713_v29  ;;  %791 = vmatpush.bf16.msra.mxu3 %v713_v29  ;;  %p942_p8 = pneg %p941_p4 }
  0x47   : > { %p947_p10 = pnand %p946_p2, %p942_p8 }
  0x48   : > { %354 = vmatpush.bf16.msra.mxu0 %v701_v34  ;;  %784 = vmatpush.bf16.msra.mxu2 %v701_v34 }
  0x49   : > { %383 = vmatpush.bf16.msra.mxu1 %v705_v35  ;;  %792 = vmatpush.bf16.msra.mxu3 %v705_v35 }
  0x4c   : > { %355 = vmatpush.bf16.msra.mxu0 %v693_v40  ;;  %785 = vmatpush.bf16.msra.mxu2 %v693_v40 }
  0x4d   : > { %384 = vmatpush.bf16.msra.mxu1 %v697_v41  ;;  %793 = vmatpush.bf16.msra.mxu3 %v697_v41 }
  0x50   : > { %356 = vmatpush.bf16.msra.mxu0 %v685_v46  ;;  %786 = vmatpush.bf16.msra.mxu2 %v685_v46 }
  0x51   : > { %385 = vmatpush.bf16.msra.mxu1 %v689_v47  ;;  %794 = vmatpush.bf16.msra.mxu3 %v689_v47 }
  0x53   : > { %357 = vmatmul.bf16.vlgmr.msra.gmra.mxu0 %v756_v48  ;;  %367 = vmatmul.bf16.vlgmr.msra.gmra.mxu2 %v758_v49 }
  0x54   : > { %386 = vmatmul.bf16.vlgmr.msra.gmra.mxu1 %v756_v48  ;;  %396 = vmatmul.bf16.vlgmr.msra.gmra.mxu3 %v758_v49 }
  0x63   : > { %362 = vmatmul.bf16.gmra.mxu0 %v757_v50  ;;  %372 = vmatmul.bf16.gmra.mxu2 %v759_v51 }
  0x64   : > { %391 = vmatmul.bf16.gmra.mxu1 %v757_v50  ;;  %401 = vmatmul.bf16.gmra.mxu3 %v759_v51 }
  0xd0   : > { %v358_v52 = vpop.f32.mrf.mxu0 }
  0xd1   : > { %407 = vst [vmem:[%s1168_s23] sm:$0xff] %v358_v52  ;;  %v387_v53 = vpop.f32.mrf.mxu1  ;;  %v449_v0 = vmul.f32 %v358_v52, %v358_v52 }
  0xd2   : > { %408 = vst [vmem:[%s1168_s23 + $0x8] sm:$0xff] %v387_v53  ;;  %v450_v3 = vmul.f32 %v387_v53, %v387_v53 }
  0xd6   : > { %v368_v54 = vpop.f32.mrf.mxu2 }
  0xd7   : > { %415 = vst [vmem:[%s1168_s23 + $0x40] sm:$0xff] %v368_v54  ;;  %v397_v55 = vpop.f32.mrf.mxu3  ;;  %v457_v20 = vmul.f32 %v368_v54, %v368_v54 }
  0xd8   : > { %416 = vst [vmem:[%s1168_s23 + $0x48] sm:$0xff] %v397_v55  ;;  %v360_v56 = vpop.f32.mrf.mxu0  ;;  %v458_v23 = vmul.f32 %v397_v55, %v397_v55 }
  0xd9   : > { %409 = vst [vmem:[%s1168_s23 + $0x10] sm:$0xff] %v360_v56  ;;  %v389_v57 = vpop.f32.mrf.mxu1  ;;  %v451_v62 = vmul.f32 %v360_v56, %v360_v56  ;;  %v423_v1 = vadd.f32 %v360_v56, %v358_v52 }
  0xda   : > { %410 = vst [vmem:[%s1168_s23 + $0x18] sm:$0xff] %v389_v57  ;;  %v452_v63 = vmul.f32 %v389_v57, %v389_v57  ;;  %v436_v4 = vadd.f32 %v389_v57, %v387_v53 }
  0xdb   : > { %v465_v7 = vadd.f32 %v451_v62, %v449_v0 }
  0xdc   : > { %v478_v10 = vadd.f32 %v452_v63, %v450_v3 }
  0xde   : > { %v370_v58 = vpop.f32.mrf.mxu2 }
  0xdf   : > { %417 = vst [vmem:[%s1168_s23 + $0x50] sm:$0xff] %v370_v58  ;;  %v399_v59 = vpop.f32.mrf.mxu3  ;;  %v459_v26 = vmul.f32 %v370_v58, %v370_v58 }
  0xe0   : > { %418 = vst [vmem:[%s1168_s23 + $0x58] sm:$0xff] %v399_v59  ;;  %v363_v60 = vpop.f32.mrf.mxu0  ;;  %v460_v29 = vmul.f32 %v399_v59, %v399_v59 }
  0xe1   : > { %411 = vst [vmem:[%s1168_s23 + $0x20] sm:$0xff] %v363_v60  ;;  %v392_v61 = vpop.f32.mrf.mxu1  ;;  %v453_v2 = vmul.f32 %v363_v60, %v363_v60  ;;  %v424_v8 = vadd.f32 %v423_v1, %v363_v60 }
  0xe2   : > { %412 = vst [vmem:[%s1168_s23 + $0x28] sm:$0xff] %v392_v61  ;;  %v454_v5 = vmul.f32 %v392_v61, %v392_v61  ;;  %v437_v11 = vadd.f32 %v436_v4, %v392_v61 }
  0xe3   : > { %v466_v13 = vadd.f32 %v465_v7, %v453_v2 }
  0xe4   : > { %v479_v17 = vadd.f32 %v478_v10, %v454_v5 }
  0xe6   : > { %v373_v6 = vpop.f32.mrf.mxu2 }
  0xe7   : > { %419 = vst [vmem:[%s1168_s23 + $0x60] sm:$0xff] %v373_v6  ;;  %v402_v9 = vpop.f32.mrf.mxu3  ;;  %v461_v33 = vmul.f32 %v373_v6, %v373_v6 }
  0xe8   : > { %420 = vst [vmem:[%s1168_s23 + $0x68] sm:$0xff] %v402_v9  ;;  %v365_v12 = vpop.f32.mrf.mxu0  ;;  %v462_v37 = vmul.f32 %v402_v9, %v402_v9 }
  0xe9   : > { %413 = vst [vmem:[%s1168_s23 + $0x30] sm:$0xff] %v365_v12  ;;  %v425_v14 = vadd.f32 %v424_v8, %v365_v12  ;;  %v455_v15 = vmul.f32 %v365_v12, %v365_v12  ;;  %v394_v16 = vpop.f32.mrf.mxu1 }
  0xea   : > { %414 = vst [vmem:[%s1168_s23 + $0x38] sm:$0xff] %v394_v16  ;;  %v438_v18 = vadd.f32 %v437_v11, %v394_v16  ;;  %v456_v19 = vmul.f32 %v394_v16, %v394_v16 }
  0xeb   : > { %v426_v21 = vadd.f32 %v425_v14, %v368_v54  ;;  %v467_v22 = vadd.f32 %v466_v13, %v455_v15 }
  0xec   : > { %v439_v24 = vadd.f32 %v438_v18, %v397_v55  ;;  %v480_v25 = vadd.f32 %v479_v17, %v456_v19 }
  0xed   : > { %v468_v27 = vadd.f32 %v467_v22, %v457_v20  ;;  %v427_v28 = vadd.f32 %v426_v21, %v370_v58 }
  0xee   : > { %v481_v30 = vadd.f32 %v480_v25, %v458_v23  ;;  %v375_v31 = vpop.f32.mrf.mxu2  ;;  %v440_v32 = vadd.f32 %v439_v24, %v399_v59 }
  0xef   : > { %421 = vst [vmem:[%s1168_s23 + $0x70] sm:$0xff] %v375_v31  ;;  %v428_v34 = vadd.f32 %v427_v28, %v373_v6  ;;  %v469_v35 = vadd.f32 %v468_v27, %v459_v26  ;;  %v404_v36 = vpop.f32.mrf.mxu3  ;;  %v463_v41 = vmul.f32 %v375_v31, %v375_v31 }
  0xf0   : > { %422 = vst [vmem:[%s1168_s23 + $0x78] sm:$0xff] %v404_v36  ;;  %v441_v38 = vadd.f32 %v440_v32, %v402_v9  ;;  %v482_v39 = vadd.f32 %v481_v30, %v460_v29 }
  0xf1   : > { %v429_v40 = vadd.f32 %v428_v34, %v375_v31  ;;  %v470_v42 = vadd.f32 %v469_v35, %v461_v33 }
  0xf2   : > { %950 = shalt.err (!%p947_p10)
}
  0xf3   : > { %s1032_s25 = smov 256   ;;  %s1033_s18 = smov 16   ;;  %v442_v43 = vadd.f32 %v441_v38, %v404_v36  ;;  %v464_v44 = vmul.f32 %v404_v36, %v404_v36  ;;  %v483_v45 = vadd.f32 %v482_v39, %v462_v37  ;;  %v430_v46 = vrot.slane %v429_v40, 4 }
  0xf4   : > { %801 = dma.vmem_to_hbm [thread:$0]  (%p1121_p7), %s1189_s27, 2048, %s1191_s28, %s502_s29, %s1032_s25, %s1032_s25, %s1033_s18   ;;  %v471_v47 = vadd.f32 %v470_v42, %v463_v41  ;;  %vm491_vm0 = vcmask 1040384   ;;  %vm497_vm1 = vcmask 1041408  }
  0xf5   : > { %v443_v48 = vrot.slane %v442_v43, 4  ;;  %v484_v49 = vadd.f32 %v483_v45, %v464_v44  ;;  %v431_v50 = vadd.f32 %v430_v46, %v429_v40  ;;  %s665_s23 = sshll.u32 %s1149_s10, 2  ;;  %s778_s17 = sshll.u32 %s1075_s16, 2 }
  0xf6   : > { %v472_v51 = vrot.slane %v471_v47, 4  ;;  %s536_s24 = scalar_lea.hbm %s1246_s3, %s778_s17  ;;  %s218_s27 = scalar_lea.vmem [#allocation8], %s665_s23 }
  0xf7   : > { %v444_v52 = vadd.f32 %v443_v48, %v442_v43  ;;  %v485_v53 = vrot.slane %v484_v49, 4  ;;  %v432_v54 = vrot.slane %v431_v50, 2  ;;  %s538_s28 = sshll.u32 %s218_s27, 4  ;;  %s540_s29 = sshll.u32 %s536_s24, 4  ;;  %s539_s28 = int_to_ptr.vmem [resolvable:$true] %s538_s28  ;;  %s541_s29 = int_to_ptr.hbm [resolvable:$true] %s540_s29 }
  0xf8   : > { %v473_v55 = vadd.f32 %v472_v51, %v471_v47  ;;  %s507_s16 = scalar_lea.sflag [#allocation9], %s1149_s10  ;;  %s965_s30 = sshra.s32 %s541_s29, 4  ;;  %s966_s30 = int_to_ptr.hbm [resolvable:$true] %s965_s30 }
  0xf9   : > { %v445_v56 = vrot.slane %v444_v52, 2  ;;  %v486_v57 = vadd.f32 %v485_v53, %v484_v49  ;;  %v433_v59 = vadd.f32 %v432_v54, %v431_v50  ;;  %s967_s7 = scalar_lea.hbm %s966_s30, 4  ;;  %s971_s9 = scalar_lea.hbm %s1246_s3, 8 }
  0xfa   : > { %v474_v58 = vrot.slane %v473_v55, 2  ;;  %p968_p12 = scmp.ne.s32.totalorder %s966_s30, %s967_s7  ;;  %p972_p3 = scmp.lt.s32.totalorder %s966_s30, %s1246_s3 }
  0xfb   : > { %v446_v60 = vadd.f32 %v445_v56, %v444_v52  ;;  %v487_v61 = vrot.slane %v486_v57, 2  ;;  %v434_v2 = vrot.slane %v433_v59, 1  ;;  %p973_p5 = scmp.lt.s32.totalorder %s971_s9, %s967_s7 }
  0xfc   : > { %v475_v62 = vadd.f32 %v474_v58, %v473_v55  ;;  %p969_p13 = pnand %p968_p12, %p1121_p7 }
  0xfd   : > { %v447_v63 = vrot.slane %v446_v60, 1  ;;  %v488_v0 = vadd.f32 %v487_v61, %v486_v57  ;;  %v435_v7 = vadd.f32 %v434_v2, %v433_v59  ;;  %p974_p1 = por %p973_p5, %p972_p3 }
  0xfe   : > { %v476_v1 = vrot.slane %v475_v62, 1  ;;  %p970_p0 = pneg %p969_p13 }
  0xff   : > { %v489_v3 = vrot.slane %v488_v0, 1  ;;  %v448_v5 = vadd.f32 %v447_v63, %v446_v60 }
 0x100   : > { %v477_v4 = vadd.f32 %v476_v1, %v475_v62  ;;  %p975_p4 = pnand %p974_p1, %p970_p0 }
 0x101   : > { %v490_v6 = vadd.f32 %v489_v3, %v488_v0 }
 0x102   : > { %v492_v10 = vsel %vm491_vm0, %v435_v7, %v477_v4 }
 0x103   : > { %v493_v8 = vsel %vm491_vm0, %v448_v5, %v490_v6 }
 0x104   : > { %v496_v9 = vrot.slane %v493_v8, 6 }
 0x106   : > { %v498_v11 = vsel %vm497_vm1, %v492_v10, %v496_v9 }
 0x107   : > { %500 = vst [vmem:[%s218_s27] sm:$0xf] %v498_v11 }
 0x108   : > { %978 = shalt.err (!%p975_p4)
}
 0x109   : > { %802 = dma.vmem_to_hbm [thread:$0]  (%p1121_p7), %s539_s28, 64, %s541_s29, %s507_s16  }
 0x10a PF: > { %s552_s10 = sand.u32 1, %s1013_s12   ;;  %p1252_p8 = scmp.ge.s32.totalorder %s1025_s15, 2 }
 0x10b   : > { %s553_s25 = scalar_lea.sflag [#allocation4], %s552_s10 }
 0x10c   : > { %p814_p11 = pnand %p1252_p8, %p1089_p6 }
 0x10e   : > { %p815_p9 = pneg %p814_p11 }
 0x110   : > { %1004 = dma.done.wait (%p815_p9), %s553_s25, 2048  }
 0x111   : > { %1006 = vsyncadd (%p815_p9), %s553_s25, 4294965248  ;;  %s563_s18 = scalar_lea.sflag [#allocation9], %s552_s10 }
 0x112   : > { %1008 = dma.done.wait (%p815_p9), %s563_s18, 64  }
 0x113   : > { %1010 = vsyncadd (%p815_p9), %s563_s18, 4294967232  ;;  %p21_p7 = scmp.ge.s32.totalorder %s1107_s26, 4   ;;  %s1253_s12 = smov %s1017_s13 }
 0x114   : > { %s1254_s13 = smov %s1021_s14  ;;  %s1255_s14 = smov %s1117_s4 }
 0x115   : > { %s1256_s15 = smov %s1107_s26  ;;  %23 = sbr.rel (!%p21_p7) target bundleno = 8 (0x8), region = 94 }
 0x11a   :  { %569 = vsyncpa [#allocation3], 1 }
 0x11b   :  { %571 = vsyncpa [#allocation3 + $0x1], 1 }
 0x11c   :  { %572 = vsyncpa [#allocation6], 1 }
 0x11d   :  { %573 = vsyncpa [#allocation4], 1 }
 0x11e   :  { %575 = vsyncpa [#allocation4 + $0x1], 1 }
 0x11f   :  { %576 = vsyncpa [#allocation9], 1 }
 0x120   :  { %578 = vsyncpa [#allocation9 + $0x1], 1 }

</bundles_post_ra>
